<compile_context>
chip_gen: v7x
topology: tpu7x:2x2x1
jax: 0.10.0
libtpu: 0.0.40
codegen_flags: <defaults>
</compile_context>

<pallas_src>
import jax
import jax.numpy as jnp
from jax.experimental import pallas as pl
from jax.experimental.pallas import tpu as pltpu


def _patch_embed_kernel(x_ref, o_ref):
    # x_ref: (Bb, TC, TN) VMEM tile; o_ref: (Bb, TN, TC) VMEM tile.
    # One clean 2-D XLU transpose per blocked batch element (static unroll,
    # Bb <= 8), avoiding a 3-D transpose with vreg churn.
    for b in range(x_ref.shape[0]):
        o_ref[b] = x_ref[b].T


def _largest_aligned_divisor(total, align, cap):
    """Largest multiple of `align` that divides `total`, capped at `cap`."""
    best = align
    k = align
    limit = min(total, cap)
    while k <= limit:
        if total % k == 0:
            best = k
        k += align
    return best


def _default_vmem_budget(kind):
    # Stay under each generation's *default* scoped-VMEM limit so no
    # vmem_limit_bytes override is needed on common paths
    # (v5e 16 MiB scoped, v6e 32 MiB, v7x 32 MiB scoped / 64 MiB physical).
    if "v2" in kind or "v3" in kind:
        return 8 << 20
    if "v5 lite" in kind or "v5e" in kind or "v5lite" in kind:
        return 12 << 20
    if "7" in kind:
        return 24 << 20
    if "v6" in kind:
        return 20 << 20
    return 12 << 20  # unknown chip: conservative, fits every generation


def _pick_tiles(B, C, N, itemsize, budget, bufs):
    """Choose (bb, tc, tn, footprint_bytes).

    bufs = number of in-flight VMEM tiles (input buffers + 2 output buffers);
    footprint ~= bufs * bb * tc * tn * itemsize.
    """

    def footprint(bb, tc, tn):
        return bufs * bb * tc * tn * itemsize

    def fits(bb, tc, tn):
        return footprint(bb, tc, tn) <= budget

    # 1) Whole per-batch slab fits: untiled (fully contiguous DMAs); amortize
    #    per-step overhead by blocking a few batch elements per step.
    if fits(1, C, N):
        bb = 1
        for cand in (8, 4, 2):
            if B % cand == 0 and fits(cand, C, N):
                bb = cand
                break
        return bb, C, N, footprint(bb, C, N)

    # 2) Slab too big: keep tc == C (contiguous, lane-dense output rows) and
    #    tile N in 128-lane multiples.
    if N % 128 == 0:
        max_tn = (budget // (bufs * C * itemsize)) // 128 * 128
        if max_tn >= 128:
            tn = _largest_aligned_divisor(N, 128, max_tn)
            return 1, C, tn, footprint(1, C, tn)

    # 3) N unaligned (or a full-C column too big): keep tn == N (full-dim
    #    exemption) and split C in 128-multiples so the output's last dim
    #    stays lane aligned.
    if C % 128 == 0:
        max_tc = (budget // (bufs * N * itemsize)) // 128 * 128
        if max_tc >= 128:
            tc = _largest_aligned_divisor(C, 128, max_tc)
            return 1, tc, N, footprint(1, tc, N)

    # 4) Tile both dims (only when both are 128-aligned).
    if C % 128 == 0 and N % 128 == 0:
        tc = 128
        max_tn = (budget // (bufs * tc * itemsize)) // 128 * 128
        if max_tn >= 128:
            tn = _largest_aligned_divisor(N, 128, max_tn)
            return 1, tc, tn, footprint(1, tc, tn)

    # 5) Last resort (both dims unaligned / extremely tight budget): one full
    #    (C, N) slab per step; the caller raises vmem_limit_bytes to cover it.
    return 1, C, N, footprint(1, C, N)


def _make_in_spec(block_shape, index_map, extra_buffering):
    if extra_buffering:
        try:
            return pl.BlockSpec(block_shape, index_map,
                                pipeline_mode=pl.Buffered(3))
        except TypeError:
            pass  # older jax without pipeline_mode: plain double-buffering
    return pl.BlockSpec(block_shape, index_map)


def patch_embed(x, *, vmem_budget_bytes=None, small_c_xla_fallback=True):
    """x: (B, C, H, W) -> (B, H*W, C), matching PatchEmbed.forward."""
    B, C, H, W = x.shape
    N = H * W
    x_flat = x.reshape(B, C, N)  # torch .flatten(2): a free view

    # Raw few-channel inputs: every Pallas output store would be a masked
    # ~C/128-lane partial row; a plain XLA transpose (or fusing into the
    # downstream projection matmul) is strictly better.
    if small_c_xla_fallback and C < 128:
        return jnp.transpose(x_flat, (0, 2, 1))

    try:
        kind = jax.devices()[0].device_kind.lower()
    except Exception:
        kind = ""
    is_v7x = "7" in kind

    if vmem_budget_bytes is None:
        vmem_budget_bytes = _default_vmem_budget(kind)

    itemsize = jnp.dtype(x.dtype).itemsize
    in_bufs = 3 if is_v7x else 2      # Buffered(3) input on v7x (DMA-issue bound)
    bufs = in_bufs + 2                # + double-buffered output
    bb, tc, tn, footprint = _pick_tiles(B, C, N, itemsize,
                                        vmem_budget_bytes, bufs)
    grid = (B // bb, N // tn, C // tc)

    in_spec = _make_in_spec((bb, tc, tn),
                            lambda bi, ni, ci: (bi, ci, ni),
                            extra_buffering=is_v7x)
    out_spec = pl.BlockSpec((bb, tn, tc), lambda bi, ni, ci: (bi, ni, ci))

    # Common paths stay under every generation's scoped-VMEM default; only
    # the unaligned last-resort path needs an explicit limit.
    vmem_limit = None
    if footprint > vmem_budget_bytes:
        vmem_limit = int(footprint + (4 << 20))

    return pl.pallas_call(
        _patch_embed_kernel,
        out_shape=jax.ShapeDtypeStruct((B, N, C), x.dtype),
        grid_spec=pltpu.PrefetchScalarGridSpec(
            num_scalar_prefetch=0,
            grid=grid,
            in_specs=[in_spec],
            out_specs=out_spec,
        ),
        compiler_params=pltpu.CompilerParams(
            dimension_semantics=("parallel", "parallel", "parallel"),
            vmem_limit_bytes=vmem_limit,
        ),
        cost_estimate=pl.CostEstimate(
            flops=0,
            transcendentals=0,
            bytes_accessed=2 * B * C * N * itemsize,
        ),
    )(x_flat)


if __name__ == "__main__":
    key = jax.random.PRNGKey(0)

    # 1) Small NCHW input consistent with the module's forward (C=4).
    #    Force the Pallas path to exercise the kernel (full-dim C blocks,
    #    batch-blocked Bb=2 slab path).
    B, C, H, W = 2, 4, 16, 16
    x = jax.random.normal(key, (B, C, H, W), dtype=jnp.float32)
    ref = jnp.transpose(x.reshape(B, C, H * W), (0, 2, 1))

    out = jax.block_until_ready(patch_embed(x, small_c_xla_fallback=False))
    assert out.shape == (B, H * W, C), out.shape
    assert out.dtype == x.dtype
    assert jnp.array_equal(out, ref), "mismatch (small-C kernel path)"

    # Default dispatch for C<128 (XLA fallback per the perf review).
    out_d = jax.block_until_ready(patch_embed(x))
    assert jnp.array_equal(out_d, ref), "mismatch (small-C XLA fallback)"

    # 2) 128-aligned dims + bf16 with a deliberately tight VMEM budget so the
    #    lane-dense N-tiled path (tc == C, tn < N) is exercised.
    B2, C2, H2, W2 = 2, 256, 32, 32
    x2 = jax.random.normal(jax.random.PRNGKey(0), (B2, C2, H2, W2),
                           dtype=jnp.bfloat16)
    ref2 = jnp.transpose(x2.reshape(B2, C2, H2 * W2), (0, 2, 1))
    out2 = jax.block_until_ready(patch_embed(x2, vmem_budget_bytes=1 << 20))
    assert out2.shape == (B2, H2 * W2, C2), out2.shape
    assert out2.dtype == x2.dtype
    assert jnp.array_equal(out2, ref2), "mismatch (N-tiled path)"

    # 3) Non-128-aligned N (14x14 patches) with large C and a tight budget so
    #    the budget-respecting C-split path (tn == N full dim) is exercised —
    #    the path that previously ignored the VMEM budget.
    B3, C3, H3, W3 = 2, 512, 14, 14
    x3 = jax.random.normal(jax.random.PRNGKey(0), (B3, C3, H3, W3),
                           dtype=jnp.float32)
    ref3 = jnp.transpose(x3.reshape(B3, C3, H3 * W3), (0, 2, 1))
    out3 = jax.block_until_ready(patch_embed(x3, vmem_budget_bytes=1 << 20))
    assert out3.shape == (B3, H3 * W3, C3), out3.shape
    assert out3.dtype == x3.dtype
    assert jnp.array_equal(out3, ref3), "mismatch (C-tiled path)"

    print("KERNEL_OK")
</pallas_src>

<mosaic_0001>
module attributes {stable_mosaic.version = 11 : i64} {
  func.func @_patch_embed_kernel(%arg0: i32, %arg1: i32, %arg2: i32, %arg3: memref<2x4x256xf32, #tpu.memory_space<vmem>>, %arg4: memref<2x256x4xf32, #tpu.memory_space<vmem>>) attributes {dimension_semantics = [#tpu.dimension_semantics<parallel>, #tpu.dimension_semantics<parallel>, #tpu.dimension_semantics<parallel>], iteration_bounds = array<i64: 1, 1, 1>, scalar_prefetch = 0 : i64, scratch_operands = 0 : i64, tpu.core_type = #tpu.core_type<tc>, window_params = [{transform_indices = @transform_0, window_bounds = array<i64: 2, 4, 256>}, {transform_indices = @transform_1, window_bounds = array<i64: 2, 256, 4>}]} {
    %c0 = arith.constant 0 : index
    %c0_0 = arith.constant 0 : index
    %c0_1 = arith.constant 0 : index
    %0 = vector.load %arg3[%c0, %c0_0, %c0_1] : memref<2x4x256xf32, #tpu.memory_space<vmem>>, vector<1x4x256xf32>
    %1 = vector.shape_cast %0 : vector<1x4x256xf32> to vector<4x256xf32>
    %2 = tpu.transpose %1, [1, 0] : vector<4x256xf32> -> vector<256x4xf32>
    %c0_2 = arith.constant 0 : index
    %c0_3 = arith.constant 0 : index
    %c0_4 = arith.constant 0 : index
    %3 = vector.load %arg4[%c0_2, %c0_3, %c0_4] : memref<2x256x4xf32, #tpu.memory_space<vmem>>, vector<1x256x4xf32>
    %4 = vector.shape_cast %3 : vector<1x256x4xf32> to vector<256x4xf32>
    %5 = vector.shape_cast %2 : vector<256x4xf32> to vector<1x256x4xf32>
    tpu.vector_store %arg4[%c0_2, %c0_3, %c0_4], %5 {strides = array<i32>} : memref<2x256x4xf32, #tpu.memory_space<vmem>>, vector<1x256x4xf32>,
    %c1 = arith.constant 1 : index
    %c0_5 = arith.constant 0 : index
    %c0_6 = arith.constant 0 : index
    %6 = vector.load %arg3[%c1, %c0_5, %c0_6] : memref<2x4x256xf32, #tpu.memory_space<vmem>>, vector<1x4x256xf32>
    %7 = vector.shape_cast %6 : vector<1x4x256xf32> to vector<4x256xf32>
    %8 = tpu.transpose %7, [1, 0] : vector<4x256xf32> -> vector<256x4xf32>
    %c1_7 = arith.constant 1 : index
    %c0_8 = arith.constant 0 : index
    %c0_9 = arith.constant 0 : index
    %9 = vector.load %arg4[%c1_7, %c0_8, %c0_9] : memref<2x256x4xf32, #tpu.memory_space<vmem>>, vector<1x256x4xf32>
    %10 = vector.shape_cast %9 : vector<1x256x4xf32> to vector<256x4xf32>
    %11 = vector.shape_cast %8 : vector<256x4xf32> to vector<1x256x4xf32>
    tpu.vector_store %arg4[%c1_7, %c0_8, %c0_9], %11 {strides = array<i32>} : memref<2x256x4xf32, #tpu.memory_space<vmem>>, vector<1x256x4xf32>,
    return
  }
  func.func @transform_0(%arg0: i32, %arg1: i32, %arg2: i32) -> (i32, i32, i32) {
    %c0_i32 = arith.constant 0 : i32
    return %arg0, %arg2, %arg1 : i32, i32, i32
  }
  func.func @transform_1(%arg0: i32, %arg1: i32, %arg2: i32) -> (i32, i32, i32) {
    %c0_i32 = arith.constant 0 : i32
    return %arg0, %arg1, %arg2 : i32, i32, i32
  }
}

</mosaic_0001>

<bundles_post_ra>
// kernel: tpu_custom_call.1
= control target key start
LH: loop header
LB: loop body
LE: loop exit
PB: predicated region body
PF: predicated region fallthrough
CT: control target
= control target key end

     0   :  { %6 = vsyncpa [#allocation3], 0  ;;  %s292_s6 = smov [#allocation2]   ;;  %s573_s0 = inlined_call_operand.hbm [shape: f32[2,4,256], index: 0, kind: input, shape index: {}]   ;;  %s574_s1 = inlined_call_operand.vmem [shape: f32[2,256,4], index: 1, kind: output, shape index: {}]  }
   0x1   :  { %s12_s7 = sshll.u32 %s292_s6, 4  ;;  %s268_s10 = scalar_lea.hbm %s573_s0, 256  ;;  %s13_s7 = int_to_ptr.vmem [resolvable:$true] %s12_s7 }
   0x2   :  { %p269_p0 = scmp.ne.s32.totalorder %s573_s0, %s268_s10  ;;  %p272_p1 = scmp.lt.u32.totalorder %s268_s10, %s573_s0 }
   0x4   :  { %p274_p2 = pnand %p272_p1, %p269_p0 }
   0x6   :  { %277 = shalt.err (!%p274_p2)
}
   0x7   :  { %s278_s15 = scalar_lea.vmem %s13_s7, 256  ;;  %p283_p4 = scmp.lt.s32.totalorder %s13_s7, %s13_s7 }
   0x8   :  { %p279_p3 = scmp.ne.s32.totalorder %s13_s7, %s278_s15  ;;  %p284_p5 = scmp.lt.s32.totalorder %s278_s15, %s278_s15 }
   0xa   :  { %p285_p6 = por %p284_p5, %p283_p4 }
   0xc   :  { %p286_p7 = pnand %p285_p6, %p279_p3 }
   0xe   :  { %289 = shalt.err (!%p286_p7)
}
   0xf   :  { %s293_s16 = smov 128   ;;  %s294_s17 = smov 8  }
  0x10   :  { %18 = dma.hbm_to_vmem [thread:$0]  %s573_s0, 256, %s13_s7, [#allocation3], %s293_s16, %s293_s16, %s294_s17  }
  0x11   :  { %290 = dma.done.wait [#allocation3], 256  }
  0x12   :  { %291 = vsyncadd [#allocation3], 4294967040  ;;  %v124_v0 = vld [vmem:[#allocation2 + $0x8] sm:$0xff]  ;;  %v22_v1 = vld [vmem:[#allocation2] sm:$0xff]  ;;  %vm90_vm0 = vcmask 31744  }
  0x13   :  { %128 = vxpose.xlu1.b32.start.end [1/1] (short) %v124_v0, 128  ;;  %26 = vxpose.xlu0.b32.start.end [1/1] (short) %v22_v1, 128  ;;  %v126_v2 = vcombine.high %v124_v0, %v124_v0  ;;  %v24_v3 = vcombine.high %v22_v1, %v22_v1 }
  0x50   :  { %160 = vxpose.xlu1.b32.start.end [1/1] (short) %v126_v2, 128  ;;  %58 = vxpose.xlu0.b32.start.end [1/1] (short) %v24_v3, 128 }
  0x93   :  { %v144_v4 = vpop.trf.xlu1  ;;  %v42_v5 = vpop.trf.xlu0 }
  0x94   :  { %230 = vst.msk [vmem:[%s574_s1 + $0x100] sm:$0xff] %vm90_vm0, %v144_v4  ;;  %91 = vst.msk [vmem:[%s574_s1] sm:$0xff] %vm90_vm0, %v42_v5 }
  0x97   :  { %v145_v6 = vpop.trf.xlu1  ;;  %v43_v7 = vpop.trf.xlu0 }
  0x98   :  { %231 = vst.msk [vmem:[%s574_s1 + $0x108] sm:$0xff] %vm90_vm0, %v145_v6  ;;  %92 = vst.msk [vmem:[%s574_s1 + $0x8] sm:$0xff] %vm90_vm0, %v43_v7 }
  0x9b   :  { %v146_v8 = vpop.trf.xlu1  ;;  %v44_v9 = vpop.trf.xlu0 }
  0x9c   :  { %232 = vst.msk [vmem:[%s574_s1 + $0x110] sm:$0xff] %vm90_vm0, %v146_v8  ;;  %93 = vst.msk [vmem:[%s574_s1 + $0x10] sm:$0xff] %vm90_vm0, %v44_v9 }
  0x9f   :  { %v147_v10 = vpop.trf.xlu1  ;;  %v45_v11 = vpop.trf.xlu0 }
  0xa0   :  { %233 = vst.msk [vmem:[%s574_s1 + $0x118] sm:$0xff] %vm90_vm0, %v147_v10  ;;  %94 = vst.msk [vmem:[%s574_s1 + $0x18] sm:$0xff] %vm90_vm0, %v45_v11 }
  0xa3   :  { %v148_v12 = vpop.trf.xlu1  ;;  %v46_v13 = vpop.trf.xlu0 }
  0xa4   :  { %234 = vst.msk [vmem:[%s574_s1 + $0x120] sm:$0xff] %vm90_vm0, %v148_v12  ;;  %95 = vst.msk [vmem:[%s574_s1 + $0x20] sm:$0xff] %vm90_vm0, %v46_v13 }
  0xa7   :  { %v149_v14 = vpop.trf.xlu1  ;;  %v47_v15 = vpop.trf.xlu0 }
  0xa8   :  { %235 = vst.msk [vmem:[%s574_s1 + $0x128] sm:$0xff] %vm90_vm0, %v149_v14  ;;  %96 = vst.msk [vmem:[%s574_s1 + $0x28] sm:$0xff] %vm90_vm0, %v47_v15 }
  0xab   :  { %v150_v16 = vpop.trf.xlu1  ;;  %v48_v17 = vpop.trf.xlu0 }
  0xac   :  { %236 = vst.msk [vmem:[%s574_s1 + $0x130] sm:$0xff] %vm90_vm0, %v150_v16  ;;  %97 = vst.msk [vmem:[%s574_s1 + $0x30] sm:$0xff] %vm90_vm0, %v48_v17 }
  0xaf   :  { %v151_v18 = vpop.trf.xlu1  ;;  %v49_v19 = vpop.trf.xlu0 }
  0xb0   :  { %237 = vst.msk [vmem:[%s574_s1 + $0x138] sm:$0xff] %vm90_vm0, %v151_v18  ;;  %98 = vst.msk [vmem:[%s574_s1 + $0x38] sm:$0xff] %vm90_vm0, %v49_v19 }
  0xb3   :  { %v152_v20 = vpop.trf.xlu1  ;;  %v50_v21 = vpop.trf.xlu0 }
  0xb4   :  { %238 = vst.msk [vmem:[%s574_s1 + $0x140] sm:$0xff] %vm90_vm0, %v152_v20  ;;  %99 = vst.msk [vmem:[%s574_s1 + $0x40] sm:$0xff] %vm90_vm0, %v50_v21 }
  0xb7   :  { %v153_v22 = vpop.trf.xlu1  ;;  %v51_v23 = vpop.trf.xlu0 }
  0xb8   :  { %239 = vst.msk [vmem:[%s574_s1 + $0x148] sm:$0xff] %vm90_vm0, %v153_v22  ;;  %100 = vst.msk [vmem:[%s574_s1 + $0x48] sm:$0xff] %vm90_vm0, %v51_v23 }
  0xbb   :  { %v154_v24 = vpop.trf.xlu1  ;;  %v52_v25 = vpop.trf.xlu0 }
  0xbc   :  { %240 = vst.msk [vmem:[%s574_s1 + $0x150] sm:$0xff] %vm90_vm0, %v154_v24  ;;  %101 = vst.msk [vmem:[%s574_s1 + $0x50] sm:$0xff] %vm90_vm0, %v52_v25 }
  0xbf   :  { %v155_v26 = vpop.trf.xlu1  ;;  %v53_v27 = vpop.trf.xlu0 }
  0xc0   :  { %241 = vst.msk [vmem:[%s574_s1 + $0x158] sm:$0xff] %vm90_vm0, %v155_v26  ;;  %102 = vst.msk [vmem:[%s574_s1 + $0x58] sm:$0xff] %vm90_vm0, %v53_v27 }
  0xc3   :  { %v156_v28 = vpop.trf.xlu1  ;;  %v54_v29 = vpop.trf.xlu0 }
  0xc4   :  { %242 = vst.msk [vmem:[%s574_s1 + $0x160] sm:$0xff] %vm90_vm0, %v156_v28  ;;  %103 = vst.msk [vmem:[%s574_s1 + $0x60] sm:$0xff] %vm90_vm0, %v54_v29 }
  0xc7   :  { %v157_v30 = vpop.trf.xlu1  ;;  %v55_v31 = vpop.trf.xlu0 }
  0xc8   :  { %243 = vst.msk [vmem:[%s574_s1 + $0x168] sm:$0xff] %vm90_vm0, %v157_v30  ;;  %104 = vst.msk [vmem:[%s574_s1 + $0x68] sm:$0xff] %vm90_vm0, %v55_v31 }
  0xcb   :  { %v158_v32 = vpop.trf.xlu1  ;;  %v56_v33 = vpop.trf.xlu0 }
  0xcc   :  { %244 = vst.msk [vmem:[%s574_s1 + $0x170] sm:$0xff] %vm90_vm0, %v158_v32  ;;  %105 = vst.msk [vmem:[%s574_s1 + $0x70] sm:$0xff] %vm90_vm0, %v56_v33 }
  0xcf   :  { %v159_v34 = vpop.trf.xlu1  ;;  %v57_v35 = vpop.trf.xlu0 }
  0xd0   :  { %245 = vst.msk [vmem:[%s574_s1 + $0x178] sm:$0xff] %vm90_vm0, %v159_v34  ;;  %106 = vst.msk [vmem:[%s574_s1 + $0x78] sm:$0xff] %vm90_vm0, %v57_v35 }
  0xd3   :  { %v176_v36 = vpop.trf.xlu1  ;;  %v74_v37 = vpop.trf.xlu0 }
  0xd4   :  { %246 = vst.msk [vmem:[%s574_s1 + $0x180] sm:$0xff] %vm90_vm0, %v176_v36  ;;  %107 = vst.msk [vmem:[%s574_s1 + $0x80] sm:$0xff] %vm90_vm0, %v74_v37 }
  0xd7   :  { %v177_v38 = vpop.trf.xlu1  ;;  %v75_v39 = vpop.trf.xlu0 }
  0xd8   :  { %247 = vst.msk [vmem:[%s574_s1 + $0x188] sm:$0xff] %vm90_vm0, %v177_v38  ;;  %108 = vst.msk [vmem:[%s574_s1 + $0x88] sm:$0xff] %vm90_vm0, %v75_v39 }
  0xdb   :  { %v178_v40 = vpop.trf.xlu1  ;;  %v76_v41 = vpop.trf.xlu0 }
  0xdc   :  { %248 = vst.msk [vmem:[%s574_s1 + $0x190] sm:$0xff] %vm90_vm0, %v178_v40  ;;  %109 = vst.msk [vmem:[%s574_s1 + $0x90] sm:$0xff] %vm90_vm0, %v76_v41 }
  0xdf   :  { %v179_v42 = vpop.trf.xlu1  ;;  %v77_v43 = vpop.trf.xlu0 }
  0xe0   :  { %249 = vst.msk [vmem:[%s574_s1 + $0x198] sm:$0xff] %vm90_vm0, %v179_v42  ;;  %110 = vst.msk [vmem:[%s574_s1 + $0x98] sm:$0xff] %vm90_vm0, %v77_v43 }
  0xe3   :  { %v180_v44 = vpop.trf.xlu1  ;;  %v78_v45 = vpop.trf.xlu0 }
  0xe4   :  { %250 = vst.msk [vmem:[%s574_s1 + $0x1a0] sm:$0xff] %vm90_vm0, %v180_v44  ;;  %111 = vst.msk [vmem:[%s574_s1 + $0xa0] sm:$0xff] %vm90_vm0, %v78_v45 }
  0xe7   :  { %v181_v46 = vpop.trf.xlu1  ;;  %v79_v47 = vpop.trf.xlu0 }
  0xe8   :  { %251 = vst.msk [vmem:[%s574_s1 + $0x1a8] sm:$0xff] %vm90_vm0, %v181_v46  ;;  %112 = vst.msk [vmem:[%s574_s1 + $0xa8] sm:$0xff] %vm90_vm0, %v79_v47 }
  0xeb   :  { %v182_v48 = vpop.trf.xlu1  ;;  %v80_v49 = vpop.trf.xlu0 }
  0xec   :  { %252 = vst.msk [vmem:[%s574_s1 + $0x1b0] sm:$0xff] %vm90_vm0, %v182_v48  ;;  %113 = vst.msk [vmem:[%s574_s1 + $0xb0] sm:$0xff] %vm90_vm0, %v80_v49 }
  0xef   :  { %v183_v50 = vpop.trf.xlu1  ;;  %v81_v51 = vpop.trf.xlu0 }
  0xf0   :  { %253 = vst.msk [vmem:[%s574_s1 + $0x1b8] sm:$0xff] %vm90_vm0, %v183_v50  ;;  %114 = vst.msk [vmem:[%s574_s1 + $0xb8] sm:$0xff] %vm90_vm0, %v81_v51 }
  0xf3   :  { %v184_v52 = vpop.trf.xlu1  ;;  %v82_v53 = vpop.trf.xlu0 }
  0xf4   :  { %254 = vst.msk [vmem:[%s574_s1 + $0x1c0] sm:$0xff] %vm90_vm0, %v184_v52  ;;  %115 = vst.msk [vmem:[%s574_s1 + $0xc0] sm:$0xff] %vm90_vm0, %v82_v53 }
  0xf7   :  { %v185_v54 = vpop.trf.xlu1  ;;  %v83_v55 = vpop.trf.xlu0 }
  0xf8   :  { %255 = vst.msk [vmem:[%s574_s1 + $0x1c8] sm:$0xff] %vm90_vm0, %v185_v54  ;;  %116 = vst.msk [vmem:[%s574_s1 + $0xc8] sm:$0xff] %vm90_vm0, %v83_v55 }
  0xfb   :  { %v186_v56 = vpop.trf.xlu1  ;;  %v84_v57 = vpop.trf.xlu0 }
  0xfc   :  { %256 = vst.msk [vmem:[%s574_s1 + $0x1d0] sm:$0xff] %vm90_vm0, %v186_v56  ;;  %117 = vst.msk [vmem:[%s574_s1 + $0xd0] sm:$0xff] %vm90_vm0, %v84_v57 }
  0xff   :  { %v187_v58 = vpop.trf.xlu1  ;;  %v85_v59 = vpop.trf.xlu0 }
 0x100   :  { %257 = vst.msk [vmem:[%s574_s1 + $0x1d8] sm:$0xff] %vm90_vm0, %v187_v58  ;;  %118 = vst.msk [vmem:[%s574_s1 + $0xd8] sm:$0xff] %vm90_vm0, %v85_v59 }
 0x103   :  { %v188_v60 = vpop.trf.xlu1  ;;  %v86_v61 = vpop.trf.xlu0 }
 0x104   :  { %258 = vst.msk [vmem:[%s574_s1 + $0x1e0] sm:$0xff] %vm90_vm0, %v188_v60  ;;  %119 = vst.msk [vmem:[%s574_s1 + $0xe0] sm:$0xff] %vm90_vm0, %v86_v61 }
 0x107   :  { %v189_v62 = vpop.trf.xlu1  ;;  %v87_v63 = vpop.trf.xlu0 }
 0x108   :  { %259 = vst.msk [vmem:[%s574_s1 + $0x1e8] sm:$0xff] %vm90_vm0, %v189_v62  ;;  %120 = vst.msk [vmem:[%s574_s1 + $0xe8] sm:$0xff] %vm90_vm0, %v87_v63 }
 0x10b   :  { %v190_v0 = vpop.trf.xlu1  ;;  %v88_v1 = vpop.trf.xlu0 }
 0x10c   :  { %260 = vst.msk [vmem:[%s574_s1 + $0x1f0] sm:$0xff] %vm90_vm0, %v190_v0  ;;  %121 = vst.msk [vmem:[%s574_s1 + $0xf0] sm:$0xff] %vm90_vm0, %v88_v1 }
 0x10f   :  { %v191_v2 = vpop.trf.xlu1  ;;  %v89_v3 = vpop.trf.xlu0 }
 0x110   :  { %261 = vst.msk [vmem:[%s574_s1 + $0x1f8] sm:$0xff] %vm90_vm0, %v191_v2  ;;  %122 = vst.msk [vmem:[%s574_s1 + $0xf8] sm:$0xff] %vm90_vm0, %v89_v3 }
 0x111   :  { %229 = vsyncpa [#allocation3], 1 }

</bundles_post_ra>
